<compile_context>
chip_gen: v6e
topology: v6e:2x2x1
jax: 0.10.0
libtpu: 0.0.40
codegen_flags: <defaults>
</compile_context>

<pallas_src>
import functools

import jax
import jax.numpy as jnp
from jax.experimental import pallas as pl
from jax.experimental.pallas import tpu as pltpu

LANE = 128


def _round_up(x, m):
    return ((x + m - 1) // m) * m


def _pad2(x, rows, cols):
    return jnp.pad(x, ((0, rows - x.shape[0]), (0, cols - x.shape[1])))


# ----------------------------------------------------------------------------
# Pallas kernel: one GCS layer + ReLU, tiled over (row blocks, reduction blocks)
# ----------------------------------------------------------------------------
def _gcs_relu_kernel(a_ref, xk_ref, wcat_ref, b_ref, o_ref, acc_ref, *, h_pad):
    """relu(A_hat @ (X W) + X W_root + b), accumulated over the k (column) axis.

    a_ref   : [tile, tile]      bf16   A_hat block (i, k)
    xk_ref  : [tile, f_pad]     bf16   X row-block k
    wcat_ref: [f_pad, 2*h_pad]  bf16   [W | W_root]
    b_ref   : [1, h_pad]        f32    bias
    o_ref   : [tile, h_pad]     bf16   output row-block i
    acc_ref : [tile, h_pad]     f32    accumulator scratch
    """
    i = pl.program_id(0)
    k = pl.program_id(1)

    @pl.when(k == 0)
    def _():
        acc_ref[...] = jnp.zeros_like(acc_ref)

    # One fused MXU pass over 2*h_pad lanes: X[k] @ [W | W_root] (bf16 in, f32 acc).
    xwcat = jnp.dot(xk_ref[...], wcat_ref[...], preferred_element_type=jnp.float32)

    # Aggregation term: A_hat[i, k] @ (X[k] @ W).
    acc_ref[...] += jnp.dot(
        a_ref[...],
        xwcat[:, :h_pad].astype(jnp.bfloat16),
        preferred_element_type=jnp.float32,
    )

    # Root/skip term X[i] @ W_root: the diagonal block (k == i) already holds it
    # (requires square tiles, tm == tk).
    @pl.when(k == i)
    def _():
        acc_ref[...] += xwcat[:, h_pad:]

    @pl.when(k == pl.num_programs(1) - 1)
    def _():
        o_ref[...] = jnp.maximum(acc_ref[...] + b_ref[...], 0.0).astype(o_ref.dtype)


def gcs_relu(a_hat, x, wcat, b, *, tile):
    """All inputs pre-padded; returns [n_pad, h_pad] bf16 node features."""
    n_pad = a_hat.shape[0]
    f_pad = x.shape[1]
    h_pad = wcat.shape[1] // 2
    grid = (n_pad // tile, n_pad // tile)

    kernel = functools.partial(_gcs_relu_kernel, h_pad=h_pad)
    return pl.pallas_call(
        kernel,
        out_shape=jax.ShapeDtypeStruct((n_pad, h_pad), jnp.bfloat16),
        grid_spec=pltpu.PrefetchScalarGridSpec(
            num_scalar_prefetch=0,
            grid=grid,
            in_specs=[
                pl.BlockSpec((tile, tile), lambda i, k: (i, k)),        # A_hat tile
                pl.BlockSpec((tile, f_pad), lambda i, k: (k, 0)),       # X k-block
                pl.BlockSpec((f_pad, 2 * h_pad), lambda i, k: (0, 0)),  # [W|W_root]
                pl.BlockSpec((1, h_pad), lambda i, k: (0, 0)),          # bias
            ],
            out_specs=pl.BlockSpec((tile, h_pad), lambda i, k: (i, 0)),
            scratch_shapes=[pltpu.VMEM((tile, h_pad), jnp.float32)],
        ),
        compiler_params=pltpu.CompilerParams(
            dimension_semantics=("parallel", "arbitrary"),
            vmem_limit_bytes=32 * 1024 * 1024,
        ),
    )(a_hat, x, wcat, b)


# ----------------------------------------------------------------------------
# Glue (plain JAX): adjacency normalization, pooling, parameter setup
# ----------------------------------------------------------------------------
def build_normalized_adjacency(edge_index, num_nodes, edge_weight=None):
    """A_hat = D^{-1/2}(A + I)D^{-1/2}.  edge_index is expected to already hold
    both directions (PyG convention), so edges are scattered once, not twice."""
    src, dst = edge_index
    if edge_weight is None:
        edge_weight = jnp.ones(src.shape[0], dtype=jnp.float32)
    a = jnp.zeros((num_nodes, num_nodes), dtype=jnp.float32)
    a = a.at[dst, src].add(edge_weight)
    a = a + jnp.eye(num_nodes, dtype=jnp.float32)  # self loops
    deg = jnp.sum(a, axis=1)
    d_inv_sqrt = jnp.where(deg > 0, 1.0 / jnp.sqrt(deg), 0.0)
    return d_inv_sqrt[:, None] * a * d_inv_sqrt[None, :]


def build_mean_pool_matrix(batch, num_graphs):
    """P[b, n] = 1/|V_b| if batch[n] == b else 0  (global_mean_pool)."""
    one_hot = (batch[None, :] == jnp.arange(num_graphs)[:, None]).astype(jnp.float32)
    counts = jnp.maximum(jnp.sum(one_hot, axis=1, keepdims=True), 1.0)
    return one_hot / counts


def init_params(key, num_features, hidden, num_classes, num_layers):
    def linear(k, fan_in, fan_out):
        k1, k2 = jax.random.split(k)
        bound = 1.0 / jnp.sqrt(jnp.float32(fan_in))
        w = jax.random.uniform(k1, (fan_in, fan_out), jnp.float32, -bound, bound)
        b = jax.random.uniform(k2, (fan_out,), jnp.float32, -bound, bound)
        return w, b

    params = {"convs": []}
    dims_in = [num_features] + [hidden] * (num_layers - 1)
    for fin in dims_in:
        key, k1, k2 = jax.random.split(key, 3)
        w, b = linear(k1, fin, hidden)
        w_root, _ = linear(k2, fin, hidden)
        params["convs"].append(dict(w=w, w_root=w_root, b=b))
    key, k1, k2 = jax.random.split(key, 3)
    params["lin1_w"], params["lin1_b"] = linear(k1, hidden, hidden)
    params["lin2_w"], params["lin2_b"] = linear(k2, hidden, num_classes)
    return params


@functools.partial(jax.jit, static_argnames=("num_graphs",))
def gcn_skip_forward(params, x, a_hat, batch, num_graphs):
    """Matches GCNSkip.forward(data) with manifold=False, manifold_layer=-1,
    cl=False, eval mode.  Returns (log_softmax logits [B, C], last [N, H])."""
    n, f = x.shape
    hidden = params["convs"][0]["w"].shape[1]

    h_pad = _round_up(hidden, LANE)
    f_pad = _round_up(f, LANE)
    n_pad = _round_up(n, LANE)
    # largest square tile dividing n_pad (keeps VMEM/double-buffering modest on
    # v7x's 64 MiB and v5e's 16 MiB scoped default)
    tile = next(t for t in (512, 256, 128) if n_pad % t == 0)

    a_pad = _pad2(a_hat, n_pad, n_pad).astype(jnp.bfloat16)
    xp = _pad2(x, n_pad, f_pad).astype(jnp.bfloat16)

    for li, c in enumerate(params["convs"]):
        fin_pad = f_pad if li == 0 else h_pad
        wcat = jnp.concatenate(
            [_pad2(c["w"], fin_pad, h_pad), _pad2(c["w_root"], fin_pad, h_pad)],
            axis=1,
        ).astype(jnp.bfloat16)
        b = jnp.pad(c["b"], (0, h_pad - hidden)).reshape(1, h_pad).astype(jnp.float32)
        xp = gcs_relu(a_pad, xp, wcat, b, tile=tile)

    last = xp[:n, :hidden].astype(jnp.float32)

    # Pooling + MLP head + log_softmax in plain JAX: B=2, H=32, C=4 is a few
    # thousand FLOPs — a dedicated pallas_call is pure launch overhead here.
    pool = build_mean_pool_matrix(batch, num_graphs)
    pooled = pool @ last
    h = jax.nn.relu(pooled @ params["lin1_w"] + params["lin1_b"])
    # dropout(p=0.5) is identity in eval mode
    logits = h @ params["lin2_w"] + params["lin2_b"]
    log_probs = jax.nn.log_softmax(logits, axis=-1)
    return log_probs, last


# ----------------------------------------------------------------------------
# Main
# ----------------------------------------------------------------------------
if __name__ == "__main__":
    key = jax.random.PRNGKey(0)

    # Small synthetic "dataset": 2 graphs x 16 nodes, 16 features, 4 classes,
    # hidden=32, num_layers=3 (conv1 + 2 extra GCS layers).
    num_graphs = 2
    nodes_per_graph = 16
    num_nodes = num_graphs * nodes_per_graph
    num_features = 16
    hidden = 32
    num_classes = 4
    num_layers = 3

    key, kx, ke = jax.random.split(key, 3)
    x = jax.random.normal(kx, (num_nodes, num_features), dtype=jnp.float32)

    # batch vector: node -> graph id
    batch = jnp.repeat(jnp.arange(num_graphs, dtype=jnp.int32), nodes_per_graph)

    # deterministic random edges, kept within each graph; store BOTH directions
    # explicitly (PyG convention) so the normalization does not double count
    edges_per_graph = 32
    ke1, ke2 = jax.random.split(ke)
    src_local = jax.random.randint(ke1, (num_graphs, edges_per_graph), 0, nodes_per_graph)
    dst_local = jax.random.randint(ke2, (num_graphs, edges_per_graph), 0, nodes_per_graph)
    offs = (jnp.arange(num_graphs, dtype=jnp.int32) * nodes_per_graph)[:, None]
    src = (src_local + offs).reshape(-1)
    dst = (dst_local + offs).reshape(-1)
    edge_index = jnp.stack(
        [jnp.concatenate([src, dst]), jnp.concatenate([dst, src])], axis=0
    )

    a_hat = build_normalized_adjacency(edge_index, num_nodes, edge_weight=None)
    params = init_params(key, num_features, hidden, num_classes, num_layers)

    log_probs, last = gcn_skip_forward(params, x, a_hat, batch, num_graphs)
    jax.block_until_ready((log_probs, last))

    assert log_probs.shape == (num_graphs, num_classes)
    assert last.shape == (num_nodes, hidden)
    # log_softmax rows should (approximately) exp-sum to 1
    assert jnp.allclose(jnp.sum(jnp.exp(log_probs), axis=-1), 1.0, atol=1e-4)

    print("KERNEL_OK")
</pallas_src>

<mosaic_0001>
module attributes {stable_mosaic.version = 11 : i64} {
  func.func @_gcs_relu_kernel(%arg0: i32, %arg1: i32, %arg2: memref<128x128xbf16, #tpu.memory_space<vmem>>, %arg3: memref<128x128xbf16, #tpu.memory_space<vmem>>, %arg4: memref<128x256xbf16, #tpu.memory_space<vmem>>, %arg5: memref<1x128xf32, #tpu.memory_space<vmem>>, %arg6: memref<128x128xbf16, #tpu.memory_space<vmem>>, %arg7: memref<128x128xf32, #tpu.memory_space<vmem>>) attributes {dimension_semantics = [#tpu.dimension_semantics<parallel>, #tpu.dimension_semantics<arbitrary>], iteration_bounds = array<i64: 1, 1>, scalar_prefetch = 0 : i64, scratch_operands = 1 : i64, tpu.core_type = #tpu.core_type<tc>, window_params = [{transform_indices = @transform_0, window_bounds = array<i64: 128, 128>}, {transform_indices = @transform_1, window_bounds = array<i64: 128, 128>}, {pipeline_mode = #tpu.pipeline_mode<synchronous>, transform_indices = @transform_2, window_bounds = array<i64: 128, 256>}, {pipeline_mode = #tpu.pipeline_mode<synchronous>, transform_indices = @transform_3, window_bounds = array<i64: 1, 128>}, {transform_indices = @transform_4, window_bounds = array<i64: 128, 128>}]} {
    %c0_i32 = arith.constant 0 : i32
    %0 = arith.cmpi eq, %arg1, %c0_i32 : i32
    %1 = arith.extui %0 : i1 to i32
    %c0_i32_0 = arith.constant 0 : i32
    %2 = arith.cmpi ne, %1, %c0_i32_0 : i32
    scf.if %2 {
      %cst_14 = arith.constant 0.000000e+00 : f32
      %19 = vector.broadcast %cst_14 : f32 to vector<128x128xf32>
      %c0_15 = arith.constant 0 : index
      %c0_16 = arith.constant 0 : index
      %20 = vector.load %arg7[%c0_15, %c0_16] : memref<128x128xf32, #tpu.memory_space<vmem>>, vector<128x128xf32>
      tpu.vector_store %arg7[%c0_15, %c0_16], %19 {strides = array<i32>} : memref<128x128xf32, #tpu.memory_space<vmem>>, vector<128x128xf32>,
    } else {
    }
    %c0 = arith.constant 0 : index
    %c0_1 = arith.constant 0 : index
    %3 = vector.load %arg3[%c0, %c0_1] : memref<128x128xbf16, #tpu.memory_space<vmem>>, vector<128x128xbf16>
    %c0_2 = arith.constant 0 : index
    %c0_3 = arith.constant 0 : index
    %4 = vector.load %arg4[%c0_2, %c0_3] : memref<128x256xbf16, #tpu.memory_space<vmem>>, vector<128x256xbf16>
    %cst = arith.constant dense<0.000000e+00> : vector<128x256xf32>
    %5 = tpu.matmul %3, %4, %cst {dimension_numbers = #tpu.dot_dimension_numbers<[1], [0], [0], [1], [0, 0, 1, 1], [], []>} : vector<128x128xbf16>, vector<128x256xbf16>, vector<128x256xf32> -> vector<128x256xf32>
    %c0_4 = arith.constant 0 : index
    %c0_5 = arith.constant 0 : index
    %6 = vector.load %arg7[%c0_4, %c0_5] : memref<128x128xf32, #tpu.memory_space<vmem>>, vector<128x128xf32>
    %c0_6 = arith.constant 0 : index
    %c0_7 = arith.constant 0 : index
    %7 = vector.load %arg2[%c0_6, %c0_7] : memref<128x128xbf16, #tpu.memory_space<vmem>>, vector<128x128xbf16>
    %8 = vector.extract_strided_slice %5 {offsets = [0, 0], sizes = [128, 128], strides = [1, 1]} : vector<128x256xf32> to vector<128x128xf32>
    %9 = arith.truncf %8 : vector<128x128xf32> to vector<128x128xbf16>
    %cst_8 = arith.constant dense<0.000000e+00> : vector<128x128xf32>
    %10 = tpu.matmul %7, %9, %cst_8 {dimension_numbers = #tpu.dot_dimension_numbers<[1], [0], [0], [1], [0, 0, 1, 1], [], []>} : vector<128x128xbf16>, vector<128x128xbf16>, vector<128x128xf32> -> vector<128x128xf32>
    %11 = arith.addf %6, %10 : vector<128x128xf32>
    %c0_9 = arith.constant 0 : index
    %c0_10 = arith.constant 0 : index
    %12 = vector.load %arg7[%c0_9, %c0_10] : memref<128x128xf32, #tpu.memory_space<vmem>>, vector<128x128xf32>
    tpu.vector_store %arg7[%c0_9, %c0_10], %11 {strides = array<i32>} : memref<128x128xf32, #tpu.memory_space<vmem>>, vector<128x128xf32>,
    %13 = arith.cmpi eq, %arg1, %arg0 : i32
    %14 = arith.extui %13 : i1 to i32
    %c0_i32_11 = arith.constant 0 : i32
    %15 = arith.cmpi ne, %14, %c0_i32_11 : i32
    scf.if %15 {
      %c0_14 = arith.constant 0 : index
      %c0_15 = arith.constant 0 : index
      %19 = vector.load %arg7[%c0_14, %c0_15] : memref<128x128xf32, #tpu.memory_space<vmem>>, vector<128x128xf32>
      %20 = vector.extract_strided_slice %5 {offsets = [0, 128], sizes = [128, 128], strides = [1, 1]} : vector<128x256xf32> to vector<128x128xf32>
      %21 = arith.addf %19, %20 : vector<128x128xf32>
      %c0_16 = arith.constant 0 : index
      %c0_17 = arith.constant 0 : index
      %22 = vector.load %arg7[%c0_16, %c0_17] : memref<128x128xf32, #tpu.memory_space<vmem>>, vector<128x128xf32>
      tpu.vector_store %arg7[%c0_16, %c0_17], %21 {strides = array<i32>} : memref<128x128xf32, #tpu.memory_space<vmem>>, vector<128x128xf32>,
    } else {
    }
    %c0_i32_12 = arith.constant 0 : i32
    %16 = arith.cmpi eq, %arg1, %c0_i32_12 : i32
    %17 = arith.extui %16 : i1 to i32
    %c0_i32_13 = arith.constant 0 : i32
    %18 = arith.cmpi ne, %17, %c0_i32_13 : i32
    scf.if %18 {
      %c0_14 = arith.constant 0 : index
      %c0_15 = arith.constant 0 : index
      %19 = vector.load %arg7[%c0_14, %c0_15] : memref<128x128xf32, #tpu.memory_space<vmem>>, vector<128x128xf32>
      %c0_16 = arith.constant 0 : index
      %c0_17 = arith.constant 0 : index
      %20 = vector.load %arg5[%c0_16, %c0_17] : memref<1x128xf32, #tpu.memory_space<vmem>>, vector<1x128xf32>
      %21 = vector.broadcast %20 : vector<1x128xf32> to vector<128x128xf32>
      %22 = arith.addf %19, %21 : vector<128x128xf32>
      %cst_18 = arith.constant 0.000000e+00 : f32
      %23 = vector.broadcast %cst_18 : f32 to vector<128x128xf32>
      %24 = arith.maximumf %22, %23 : vector<128x128xf32>
      %25 = arith.truncf %24 : vector<128x128xf32> to vector<128x128xbf16>
      %c0_19 = arith.constant 0 : index
      %c0_20 = arith.constant 0 : index
      %26 = vector.load %arg6[%c0_19, %c0_20] : memref<128x128xbf16, #tpu.memory_space<vmem>>, vector<128x128xbf16>
      tpu.vector_store %arg6[%c0_19, %c0_20], %25 {strides = array<i32>} : memref<128x128xbf16, #tpu.memory_space<vmem>>, vector<128x128xbf16>,
    } else {
    }
    return
  }
  func.func @transform_0(%arg0: i32, %arg1: i32) -> (i32, i32) {
    %c0_i32 = arith.constant 0 : i32
    return %arg0, %arg1 : i32, i32
  }
  func.func @transform_1(%arg0: i32, %arg1: i32) -> (i32, i32) {
    %c0_i32 = arith.constant 0 : i32
    %c0_i32_0 = arith.constant 0 : i32
    return %arg1, %c0_i32 : i32, i32
  }
  func.func @transform_2(%arg0: i32, %arg1: i32) -> (i32, i32) {
    %c0_i32 = arith.constant 0 : i32
    %c0_i32_0 = arith.constant 0 : i32
    %c0_i32_1 = arith.constant 0 : i32
    return %c0_i32, %c0_i32_0 : i32, i32
  }
  func.func @transform_3(%arg0: i32, %arg1: i32) -> (i32, i32) {
    %c0_i32 = arith.constant 0 : i32
    %c0_i32_0 = arith.constant 0 : i32
    %c0_i32_1 = arith.constant 0 : i32
    return %c0_i32, %c0_i32_0 : i32, i32
  }
  func.func @transform_4(%arg0: i32, %arg1: i32) -> (i32, i32) {
    %c0_i32 = arith.constant 0 : i32
    %c0_i32_0 = arith.constant 0 : i32
    return %arg0, %c0_i32 : i32, i32
  }
}

</mosaic_0001>

<bundles_post_ra>
// kernel: gcn_skip_forward.3
= control target key start
LH: loop header
LB: loop body
LE: loop exit
PB: predicated region body
PF: predicated region fallthrough
CT: control target
= control target key end

     0   :  { %v923_v1 = vmov 0   ;;  %s1135_s2 = inlined_call_operand.vmem [shape: bf16[128,256], index: 2, kind: input, shape index: {}]   ;;  %s1136_s1 = inlined_call_operand.vmem [shape: bf16[128,128], index: 1, kind: input, shape index: {}]   ;;  %s1137_s0 = inlined_call_operand.vmem [shape: bf16[128,128], index: 0, kind: input, shape index: {}]   ;;  %s1138_s3 = inlined_call_operand.vmem [shape: f32[1,128], index: 3, kind: input, shape index: {}]   ;;  %s1139_s4 = inlined_call_operand.vmem [shape: bf16[128,128], index: 4, kind: output, shape index: {}]  }
   0x1   :  { %v883_v0 = vld [vmem:[%s1135_s2 + $0x74] ss:$8 sps:$4 sm:$0xff]   ;;  %230 = vmatprep.mubr.bf16.mxu0 %v923_v1  ;;  %v885_v2 = vld [vmem:[%s1135_s2 + $0x70] ss:$8 sps:$4 sm:$0xff]   ;;  %v886_v3 = vld [vmem:[%s1135_s2 + $0x64] ss:$8 sps:$4 sm:$0xff]  }
   0x2   :  { %198 = vmatprep.subr.bf16.mxu0 %v883_v0  ;;  %v888_v4 = vld [vmem:[%s1135_s2 + $0x60] ss:$8 sps:$4 sm:$0xff]   ;;  %v889_v5 = vld [vmem:[%s1135_s2 + $0x54] ss:$8 sps:$4 sm:$0xff]   ;;  %v891_v6 = vld [vmem:[%s1135_s2 + $0x50] ss:$8 sps:$4 sm:$0xff]  }
   0x3   :  { %199 = vmatpush1.bf16.msra.mxu0 %v885_v2  ;;  %v892_v7 = vld [vmem:[%s1135_s2 + $0x44] ss:$8 sps:$4 sm:$0xff]   ;;  %v894_v8 = vld [vmem:[%s1135_s2 + $0x40] ss:$8 sps:$4 sm:$0xff]   ;;  %v895_v9 = vld [vmem:[%s1135_s2 + $0x34] ss:$8 sps:$4 sm:$0xff]  }
   0x4   :  { %200 = vmatprep.subr.bf16.mxu0 %v886_v3  ;;  %v897_v10 = vld [vmem:[%s1135_s2 + $0x30] ss:$8 sps:$4 sm:$0xff]   ;;  %v898_v11 = vld [vmem:[%s1135_s2 + $0x24] ss:$8 sps:$4 sm:$0xff]   ;;  %v900_v12 = vld [vmem:[%s1135_s2 + $0x20] ss:$8 sps:$4 sm:$0xff]  }
   0x5   :  { %v901_v13 = vld [vmem:[%s1135_s2 + $0x14] ss:$8 sps:$4 sm:$0xff]   ;;  %v903_v14 = vld [vmem:[%s1135_s2 + $0x10] ss:$8 sps:$4 sm:$0xff]   ;;  %v904_v15 = vld [vmem:[%s1135_s2 + $0x4] ss:$8 sps:$4 sm:$0xff]  }
   0x6   :  { %v906_v16 = vld [vmem:[%s1135_s2] ss:$8 sps:$4 sm:$0xff]   ;;  %v909_v19 = vld [vmem:[%s1136_s1 + $0x10] sm:$0xff]   ;;  %v910_v20 = vld [vmem:[%s1136_s1 + $0x18] sm:$0xff]  }
   0x7   :  { %201 = vmatpush1.bf16.msra.mxu0 %v888_v4  ;;  %v907_v17 = vld [vmem:[%s1136_s1] sm:$0xff]   ;;  %v908_v18 = vld [vmem:[%s1136_s1 + $0x8] sm:$0xff]   ;;  %v913_v23 = vld [vmem:[%s1136_s1 + $0x30] sm:$0xff]  }
   0x8   :  { %202 = vmatprep.subr.bf16.mxu0 %v889_v5  ;;  %v911_v21 = vld [vmem:[%s1136_s1 + $0x20] sm:$0xff]   ;;  %v912_v22 = vld [vmem:[%s1136_s1 + $0x28] sm:$0xff]   ;;  %v914_v24 = vld [vmem:[%s1136_s1 + $0x38] sm:$0xff]  }
   0x9   :  { %v915_v25 = vld [vmem:[%s1137_s0] sm:$0xff]   ;;  %v917_v2 = vld [vmem:[%s1137_s0 + $0x10] sm:$0xff]   ;;  %v918_v3 = vld [vmem:[%s1137_s0 + $0x18] sm:$0xff]  }
   0xa   :  { %866 = vmatprep.mubr.bf16.mxu1 %v915_v25  ;;  %v919_v4 = vld [vmem:[%s1137_s0 + $0x20] sm:$0xff]   ;;  %v920_v5 = vld [vmem:[%s1137_s0 + $0x28] sm:$0xff]  }
   0xb   :  { %203 = vmatpush1.bf16.msra.mxu0 %v891_v6  ;;  %v921_v6 = vld [vmem:[%s1137_s0 + $0x30] sm:$0xff]  }
   0xc   :  { %204 = vmatprep.subr.bf16.mxu0 %v892_v7  ;;  %v922_v7 = vld [vmem:[%s1137_s0 + $0x38] sm:$0xff]  }
   0xf   :  { %205 = vmatpush1.bf16.msra.mxu0 %v894_v8 }
  0x10   :  { %206 = vmatprep.subr.bf16.mxu0 %v895_v9 }
  0x13   :  { %207 = vmatpush1.bf16.msra.mxu0 %v897_v10  ;;  %v1079_v10 = vld [vmem:[%s1138_s3] ss:$0 sm:$0xff] }
  0x14   :  { %208 = vmatprep.subr.bf16.mxu0 %v898_v11 }
  0x17   :  { %209 = vmatpush1.bf16.msra.mxu0 %v900_v12 }
  0x18   :  { %210 = vmatprep.subr.bf16.mxu0 %v901_v13 }
  0x1b   :  { %211 = vmatpush1.bf16.msra.mxu0 %v903_v14 }
  0x1c   :  { %212 = vmatprep.subr.bf16.mxu0 %v904_v15 }
  0x1f   :  { %213 = vmatpush1.bf16.msra.mxu0 %v906_v16 }
  0x22   :  { %231 = vmatmul.mubr.bf16.vlgmr.msra.gmra.mxu0 %v907_v17 }
  0x23   :  { %240 = vmatprep.mubr.bf16.mxu0 %v923_v1 }
  0x2a   :  { %241 = vmatmul.mubr.bf16.gmra.mxu0 %v908_v18 }
  0x2b   :  { %250 = vmatprep.mubr.bf16.mxu0 %v923_v1 }
  0x32   :  { %251 = vmatmul.mubr.bf16.gmra.mxu0 %v909_v19 }
  0x33   :  { %260 = vmatprep.mubr.bf16.mxu0 %v923_v1 }
  0x3a   :  { %261 = vmatmul.mubr.bf16.gmra.mxu0 %v910_v20 }
  0x3b   :  { %270 = vmatprep.mubr.bf16.mxu0 %v923_v1 }
  0x42   :  { %271 = vmatmul.mubr.bf16.gmra.mxu0 %v911_v21 }
  0x43   :  { %280 = vmatprep.mubr.bf16.mxu0 %v923_v1 }
  0x4a   :  { %281 = vmatmul.mubr.bf16.gmra.mxu0 %v912_v22 }
  0x4b   :  { %290 = vmatprep.mubr.bf16.mxu0 %v923_v1 }
  0x52   :  { %291 = vmatmul.mubr.bf16.gmra.mxu0 %v913_v23 }
  0x53   :  { %300 = vmatprep.mubr.bf16.mxu0 %v923_v1  ;;  %v916_v1 = vld [vmem:[%s1137_s0 + $0x8] sm:$0xff]  }
  0x5a   :  { %301 = vmatmul.mubr.bf16.gmra.mxu0 %v914_v24 }
  0xe2   :  { %v232_v26 = vpop.f32.mrf.mxu0 }
  0xe4   :  { %v1024_v27 = vpop.f32.mrf.mxu0 }
  0xe6   :  { %v236_v28 = vpop.f32.mrf.mxu0 }
  0xe7   :  { %v343_v29 = vpack.c.bf16 %v236_v28, %v232_v26 }
  0xe8   :  { %v1026_v30 = vpop.f32.mrf.mxu0 }
  0xea   :  { %v242_v31 = vpop.f32.mrf.mxu0 }
  0xec   :  { %v1028_v32 = vpop.f32.mrf.mxu0 }
  0xee   :  { %v246_v33 = vpop.f32.mrf.mxu0 }
  0xef   :  { %v344_v34 = vpack.c.bf16 %v246_v33, %v242_v31 }
  0xf0   :  { %v1030_v35 = vpop.f32.mrf.mxu0 }
  0xf2   :  { %v252_v36 = vpop.f32.mrf.mxu0 }
  0xf4   :  { %v1032_v37 = vpop.f32.mrf.mxu0 }
  0xf6   :  { %v256_v38 = vpop.f32.mrf.mxu0 }
  0xf7   :  { %v345_v0 = vpack.c.bf16 %v256_v38, %v252_v36 }
  0xf8   :  { %v1034_v39 = vpop.f32.mrf.mxu0 }
  0xfa   :  { %v262_v40 = vpop.f32.mrf.mxu0 }
  0xfc   :  { %v1036_v41 = vpop.f32.mrf.mxu0 }
  0xfe   :  { %v266_v42 = vpop.f32.mrf.mxu0 }
  0xff   :  { %v346_v63 = vpack.c.bf16 %v266_v42, %v262_v40 }
 0x100   :  { %v1038_v43 = vpop.f32.mrf.mxu0 }
 0x102   :  { %v272_v44 = vpop.f32.mrf.mxu0 }
 0x104   :  { %v1040_v45 = vpop.f32.mrf.mxu0 }
 0x106   :  { %v276_v46 = vpop.f32.mrf.mxu0 }
 0x107   :  { %v347_v62 = vpack.c.bf16 %v276_v46, %v272_v44 }
 0x108   :  { %v1042_v47 = vpop.f32.mrf.mxu0 }
 0x10a   :  { %v282_v48 = vpop.f32.mrf.mxu0 }
 0x10c   :  { %v1044_v49 = vpop.f32.mrf.mxu0 }
 0x10e   :  { %v286_v50 = vpop.f32.mrf.mxu0 }
 0x10f   :  { %v348_v61 = vpack.c.bf16 %v286_v50, %v282_v48 }
 0x110   :  { %v1046_v51 = vpop.f32.mrf.mxu0 }
 0x112   :  { %v292_v52 = vpop.f32.mrf.mxu0 }
 0x114   :  { %v1048_v53 = vpop.f32.mrf.mxu0 }
 0x116   :  { %v296_v54 = vpop.f32.mrf.mxu0 }
 0x117   :  { %v349_v60 = vpack.c.bf16 %v296_v54, %v292_v52 }
 0x118   :  { %v1050_v55 = vpop.f32.mrf.mxu0 }
 0x11a   :  { %v302_v56 = vpop.f32.mrf.mxu0 }
 0x11c   :  { %v1052_v57 = vpop.f32.mrf.mxu0 }
 0x11e   :  { %v306_v58 = vpop.f32.mrf.mxu0 }
 0x11f   :  { %v350_v59 = vpack.c.bf16 %v306_v58, %v302_v56 }
 0x121   :  { %850 = vmatprep.subr.bf16.mxu1 %v350_v59 }
 0x122   :  { %851 = vmatpush3.bf16.msra.mxu1 %v350_v59 }
 0x123   :  { %852 = vmatprep.subr.bf16.mxu1 %v349_v60 }
 0x126   :  { %853 = vmatpush3.bf16.msra.mxu1 %v349_v60 }
 0x127   :  { %854 = vmatprep.subr.bf16.mxu1 %v348_v61 }
 0x12a   :  { %855 = vmatpush3.bf16.msra.mxu1 %v348_v61 }
 0x12b   :  { %856 = vmatprep.subr.bf16.mxu1 %v347_v62 }
 0x12e   :  { %857 = vmatpush3.bf16.msra.mxu1 %v347_v62 }
 0x12f   :  { %858 = vmatprep.subr.bf16.mxu1 %v346_v63 }
 0x132   :  { %859 = vmatpush3.bf16.msra.mxu1 %v346_v63 }
 0x133   :  { %860 = vmatprep.subr.bf16.mxu1 %v345_v0 }
 0x136   :  { %861 = vmatpush3.bf16.msra.mxu1 %v345_v0 }
 0x137   :  { %862 = vmatprep.subr.bf16.mxu1 %v344_v34 }
 0x13a   :  { %863 = vmatpush3.bf16.msra.mxu1 %v344_v34 }
 0x13b   :  { %864 = vmatprep.subr.bf16.mxu1 %v343_v29 }
 0x13e   :  { %865 = vmatpush3.bf16.msra.mxu1 %v343_v29 }
 0x141   :  { %867 = vmatmul.mubr.bf16.vlgmr.msra.gmra.mxu1 %v916_v1 }
 0x142   :  { %870 = vmatprep.mubr.bf16.mxu1 %v917_v2 }
 0x149   :  { %871 = vmatmul.mubr.bf16.gmra.mxu1 %v918_v3 }
 0x14a   :  { %874 = vmatprep.mubr.bf16.mxu1 %v919_v4 }
 0x151   :  { %875 = vmatmul.mubr.bf16.gmra.mxu1 %v920_v5 }
 0x152   :  { %878 = vmatprep.mubr.bf16.mxu1 %v921_v6  ;;  %v308_v6 = vpop.f32.mrf.mxu0 }
 0x159   :  { %879 = vmatmul.mubr.bf16.gmra.mxu1 %v922_v7 }
 0x201   :  { %v868_v8 = vpop.f32.mrf.mxu1 }
 0x202   :  { %v550_v9 = vadd.f32 %v868_v8, %v1028_v32 }
 0x203   :  { %v433_v11 = vpop.f32.mrf.mxu1 }
 0x204   :  { %v548_v12 = vadd.f32 %v433_v11, %v1024_v27  ;;  %v608_v14 = vadd.f32 %v1079_v10, %v550_v9 }
 0x205   :  { %v869_v13 = vpop.f32.mrf.mxu1 }
 0x206   :  { %v551_v15 = vadd.f32 %v869_v13, %v1030_v35  ;;  %v606_v17 = vadd.f32 %v1079_v10, %v548_v12  ;;  %v624_v21 = vmax.f32 %v608_v14, 0.0 }
 0x207   :  { %v436_v16 = vpop.f32.mrf.mxu1 }
 0x208   :  { %v609_v18 = vadd.f32 %v1079_v10, %v551_v15  ;;  %v549_v19 = vadd.f32 %v436_v16, %v1026_v30  ;;  %v622_v26 = vmax.f32 %v606_v17, 0.0 }
 0x209   :  { %v872_v20 = vpop.f32.mrf.mxu1 }
 0x20a   :  { %v625_v22 = vmax.f32 %v609_v18, 0.0  ;;  %v607_v23 = vadd.f32 %v1079_v10, %v549_v19  ;;  %v554_v24 = vadd.f32 %v872_v20, %v1036_v41 }
 0x20b   :  { %v449_v25 = vpop.f32.mrf.mxu1 }
 0x20c   :  { %v795_v27 = vpack.c.bf16 %v625_v22, %v624_v21  ;;  %v623_v28 = vmax.f32 %v607_v23, 0.0  ;;  %v552_v29 = vadd.f32 %v449_v25, %v1032_v37  ;;  %v612_v30 = vadd.f32 %v1079_v10, %v554_v24 }
 0x20d   :  { %v873_v31 = vpop.f32.mrf.mxu1 }
 0x20e   :  { %827 = vst [vmem:[%s1139_s4 + $0x8] sm:$0xff] %v795_v27   ;;  %v790_v32 = vpack.c.bf16 %v623_v28, %v622_v26  ;;  %v555_v33 = vadd.f32 %v873_v31, %v1038_v43  ;;  %v610_v35 = vadd.f32 %v1079_v10, %v552_v29  ;;  %v628_v40 = vmax.f32 %v612_v30, 0.0 }
 0x20f   :  { %v452_v34 = vpop.f32.mrf.mxu1 }
 0x210   :  { %791 = vst [vmem:[%s1139_s4] sm:$0xff] %v790_v32   ;;  %v613_v36 = vadd.f32 %v1079_v10, %v555_v33  ;;  %v553_v37 = vadd.f32 %v452_v34, %v1034_v39  ;;  %v626_v43 = vmax.f32 %v610_v35, 0.0 }
 0x211   :  { %v876_v38 = vpop.f32.mrf.mxu1 }
 0x212   :  { %v629_v41 = vmax.f32 %v613_v36, 0.0  ;;  %v611_v42 = vadd.f32 %v1079_v10, %v553_v37  ;;  %v558_v44 = vadd.f32 %v876_v38, %v1044_v49 }
 0x213   :  { %v465_v46 = vpop.f32.mrf.mxu1 }
 0x214   :  { %v805_v48 = vpack.c.bf16 %v629_v41, %v628_v40  ;;  %v627_v50 = vmax.f32 %v611_v42, 0.0  ;;  %v556_v52 = vadd.f32 %v465_v46, %v1040_v45  ;;  %v616_v39 = vadd.f32 %v1079_v10, %v558_v44 }
 0x215   :  { %v877_v54 = vpop.f32.mrf.mxu1 }
 0x216   :  { %829 = vst [vmem:[%s1139_s4 + $0x18] sm:$0xff] %v805_v48   ;;  %v800_v56 = vpack.c.bf16 %v627_v50, %v626_v43  ;;  %v559_v58 = vadd.f32 %v877_v54, %v1046_v51  ;;  %v614_v49 = vadd.f32 %v1079_v10, %v556_v52  ;;  %v632_v62 = vmax.f32 %v616_v39, 0.0 }
 0x217   :  { %v468_v59 = vpop.f32.mrf.mxu1 }
 0x218   :  { %828 = vst [vmem:[%s1139_s4 + $0x10] sm:$0xff] %v800_v56   ;;  %v617_v60 = vadd.f32 %v1079_v10, %v559_v58  ;;  %v557_v45 = vadd.f32 %v468_v59, %v1042_v47  ;;  %v630_v51 = vmax.f32 %v614_v49, 0.0 }
 0x219   :  { %v880_v61 = vpop.f32.mrf.mxu1 }
 0x21a   :  { %v633_v63 = vmax.f32 %v617_v60, 0.0  ;;  %v615_v0 = vadd.f32 %v1079_v10, %v557_v45  ;;  %v562_v1 = vadd.f32 %v880_v61, %v1052_v57 }
 0x21b   :  { %v481_v2 = vpop.f32.mrf.mxu1 }
 0x21c   :  { %v815_v3 = vpack.c.bf16 %v633_v63, %v632_v62  ;;  %v631_v4 = vmax.f32 %v615_v0, 0.0  ;;  %v560_v5 = vadd.f32 %v481_v2, %v1048_v53  ;;  %v620_v8 = vadd.f32 %v1079_v10, %v562_v1 }
 0x21d   :  { %v881_v7 = vpop.f32.mrf.mxu1 }
 0x21e   :  { %831 = vst [vmem:[%s1139_s4 + $0x28] sm:$0xff] %v815_v3   ;;  %v810_v47 = vpack.c.bf16 %v631_v4, %v630_v51  ;;  %v563_v9 = vadd.f32 %v881_v7, %v308_v6  ;;  %v618_v57 = vadd.f32 %v1079_v10, %v560_v5  ;;  %v636_v13 = vmax.f32 %v620_v8, 0.0 }
 0x21f   :  { %v484_v11 = vpop.f32.mrf.mxu1 }
 0x220   :  { %830 = vst [vmem:[%s1139_s4 + $0x20] sm:$0xff] %v810_v47   ;;  %v621_v12 = vadd.f32 %v1079_v10, %v563_v9  ;;  %v561_v53 = vadd.f32 %v484_v11, %v1050_v55  ;;  %v634_v16 = vmax.f32 %v618_v57, 0.0 }
 0x222   :  { %v637_v14 = vmax.f32 %v621_v12, 0.0  ;;  %v619_v15 = vadd.f32 %v1079_v10, %v561_v53 }
 0x224   :  { %v825_v17 = vpack.c.bf16 %v637_v14, %v636_v13  ;;  %v635_v18 = vmax.f32 %v619_v15, 0.0 }
 0x226   :  { %833 = vst [vmem:[%s1139_s4 + $0x38] sm:$0xff] %v825_v17   ;;  %v820_v19 = vpack.c.bf16 %v635_v18, %v634_v16 }
 0x228   :  { %832 = vst [vmem:[%s1139_s4 + $0x30] sm:$0xff] %v820_v19  }

</bundles_post_ra>
